<compile_context>
chip_gen: v7x
topology: tpu7x:2x2x1
jax: 0.10.0
libtpu: 0.0.40
codegen_flags: <defaults>
</compile_context>

<pallas_src>
import functools

import jax
import jax.numpy as jnp
from jax.experimental import pallas as pl
from jax.experimental.pallas import tpu as pltpu

LN_EPS = 1e-5
NEG_INF = -1e10


def _layernorm(x, gamma, beta):
    mu = jnp.mean(x, axis=-1, keepdims=True)
    var = jnp.mean((x - mu) ** 2, axis=-1, keepdims=True)
    return (x - mu) * jax.lax.rsqrt(var + LN_EPS) * gamma + beta


def hdd_kernel(obs_ref, rew_ref, ret_ref, pvec_ref, w1_ref, w2_ref, w3_ref,
               avail_ref, out_ref, *, obs_dim, d_in, hidden, a_pad, ret_scale):
    obs = obs_ref[...]                       # [TB, obs_dim]
    rew = rew_ref[...]                       # [TB, 1]
    ret = ret_ref[...] / ret_scale           # [TB, 1]   (scaling fused into kernel)

    pv = pvec_ref[...]                       # [9, P] packed parameter vectors
    g_obs = pv[0:1, :obs_dim]
    g_rew = pv[0:1, obs_dim:obs_dim + 1]
    g_ret = pv[0:1, obs_dim + 1:d_in]
    bt_obs = pv[1:2, :obs_dim]
    bt_rew = pv[1:2, obs_dim:obs_dim + 1]
    bt_ret = pv[1:2, obs_dim + 1:d_in]
    b1 = pv[2:3, :hidden]
    ln1_g = pv[3:4, :hidden]
    ln1_b = pv[4:5, :hidden]
    b2 = pv[5:6, :hidden]
    ln2_g = pv[6:7, :hidden]
    ln2_b = pv[7:8, :hidden]
    b3 = pv[8:9, :a_pad]

    # --- feature LayerNorm over the *virtual* concat [obs, last_rew, ret] ---
    inv_n = 1.0 / d_in
    mu = (jnp.sum(obs, axis=-1, keepdims=True) + rew + ret) * inv_n
    d_obs = obs - mu
    d_rew = rew - mu
    d_ret = ret - mu
    var = (jnp.sum(d_obs * d_obs, axis=-1, keepdims=True)
           + d_rew * d_rew + d_ret * d_ret) * inv_n
    inv_std = jax.lax.rsqrt(var + LN_EPS)
    xn_obs = d_obs * inv_std * g_obs + bt_obs          # [TB, obs_dim]
    xn_rew = d_rew * inv_std * g_rew + bt_rew          # [TB, 1]
    xn_ret = d_ret * inv_std * g_ret + bt_ret          # [TB, 1]

    # --- MLP layer 1: (concat @ W1) computed as split matmul + two rank-1 terms ---
    w1 = w1_ref[...]                                   # [d_in, H]
    h = (jnp.dot(xn_obs, w1[:obs_dim, :], preferred_element_type=jnp.float32)
         + xn_rew * w1[obs_dim:obs_dim + 1, :]
         + xn_ret * w1[obs_dim + 1:obs_dim + 2, :]
         + b1)
    h = jnp.maximum(h, 0.0)
    h = _layernorm(h, ln1_g, ln1_b)                    # [TB, H]

    # --- MLP hidden layer (layer_N = 1) ---
    h = jnp.dot(h, w2_ref[...], preferred_element_type=jnp.float32) + b2
    h = jnp.maximum(h, 0.0)
    h = _layernorm(h, ln2_g, ln2_b)                    # [TB, H]

    # --- action head: Categorical logits + availability mask (lane-dense, padded) ---
    logits = jnp.dot(h, w3_ref[...], preferred_element_type=jnp.float32) + b3
    out_ref[...] = jnp.where(avail_ref[...] == 0.0, NEG_INF, logits)   # [TB, A_PAD]


def make_params(key, obs_dim, hidden, act_dim, extra_inputs=2):
    d_in = obs_dim + extra_inputs  # + last_rew + ret
    ks = jax.random.split(key, 3)

    def lin(k, fan_in, fan_out):
        w = jax.random.normal(k, (fan_in, fan_out), jnp.float32) * (1.0 / jnp.sqrt(fan_in))
        b = jnp.zeros((1, fan_out), jnp.float32)
        return w, b

    w1, b1 = lin(ks[0], d_in, hidden)
    w2, b2 = lin(ks[1], hidden, hidden)
    w3, b3 = lin(ks[2], hidden, act_dim)
    ones = lambda n: jnp.ones((1, n), jnp.float32)
    zeros = lambda n: jnp.zeros((1, n), jnp.float32)
    return dict(
        fn_g=ones(d_in), fn_b=zeros(d_in),
        w1=w1, b1=b1, ln1_g=ones(hidden), ln1_b=zeros(hidden),
        w2=w2, b2=b2, ln2_g=ones(hidden), ln2_b=zeros(hidden),
        w3=w3, b3=b3,
    )


def _round_up(x, m):
    return ((x + m - 1) // m) * m


@functools.partial(jax.jit, static_argnames=("ret_scale", "tb"))
def hdd_forward(params, obs, ret, last_rew, available_actions, *, ret_scale=10.0, tb=512):
    """Fused HDD forward: returns masked Categorical logits."""
    obs = obs.astype(jnp.float32)
    ret = ret.astype(jnp.float32)
    last_rew = last_rew.astype(jnp.float32)
    avail = available_actions.astype(jnp.float32)

    B, obs_dim = obs.shape
    d_in = obs_dim + 2
    H = params["w1"].shape[1]
    A = params["w3"].shape[1]

    LANE = 128
    a_pad = _round_up(max(A, 1), LANE)                          # lane-dense logits / avail
    p_width = max(_round_up(d_in, LANE), _round_up(H, LANE), a_pad)

    # Batch tiling: tb multiple of 8 sublanes; pad B up so every tile is full.
    tb_eff = min(_round_up(tb, 8), _round_up(B, 8))
    b_pad = _round_up(B, tb_eff)
    n_steps = b_pad // tb_eff

    pad_rows = lambda x: jnp.pad(x, ((0, b_pad - B), (0, 0)))
    obs_p = pad_rows(obs)
    rew_p = pad_rows(last_rew)
    ret_p = pad_rows(ret)
    avail_p = jnp.pad(avail, ((0, b_pad - B), (0, a_pad - A)))

    # Pack the 9 small parameter vectors into one lane-padded array (single DMA).
    row = lambda v: jnp.pad(v.reshape(1, -1), ((0, 0), (0, p_width - v.shape[-1])))
    pvec = jnp.concatenate([
        row(params["fn_g"]), row(params["fn_b"]),
        row(params["b1"]), row(params["ln1_g"]), row(params["ln1_b"]),
        row(params["b2"]), row(params["ln2_g"]), row(params["ln2_b"]),
        row(params["b3"]),
    ], axis=0)                                                   # [9, p_width]

    w3_p = jnp.pad(params["w3"], ((0, 0), (0, a_pad - A)))       # [H, a_pad]

    kernel = functools.partial(hdd_kernel, obs_dim=obs_dim, d_in=d_in,
                               hidden=H, a_pad=a_pad, ret_scale=float(ret_scale))

    batched = lambda shape: pl.BlockSpec(shape, lambda i: (i,) + (0,) * (len(shape) - 1))
    full = lambda shape: pl.BlockSpec(shape, lambda i: (0,) * len(shape))

    out = pl.pallas_call(
        kernel,
        out_shape=jax.ShapeDtypeStruct((b_pad, a_pad), jnp.float32),
        grid=(n_steps,),
        in_specs=[
            batched((tb_eff, obs_dim)),      # obs
            batched((tb_eff, 1)),            # last_rew
            batched((tb_eff, 1)),            # ret (unscaled; scaled in kernel)
            full((9, p_width)),              # packed param vectors
            full((d_in, H)),                 # W1
            full((H, H)),                    # W2
            full((H, a_pad)),                # W3 (lane-padded)
            batched((tb_eff, a_pad)),        # available_actions (lane-padded)
        ],
        out_specs=batched((tb_eff, a_pad)),
        compiler_params=pltpu.CompilerParams(dimension_semantics=("parallel",)),
    )(obs_p, rew_p, ret_p, pvec, params["w1"], params["w2"], w3_p, avail_p)

    return out[:B, :A]


def hdd_reference(params, obs, ret, last_rew, available_actions, *, ret_scale=10.0):
    """Pure-JAX reference for correctness checking."""
    x = jnp.concatenate([obs, last_rew, ret / ret_scale], axis=-1).astype(jnp.float32)
    x = _layernorm(x, params["fn_g"], params["fn_b"])
    h = jnp.maximum(x @ params["w1"] + params["b1"], 0.0)
    h = _layernorm(h, params["ln1_g"], params["ln1_b"])
    h = jnp.maximum(h @ params["w2"] + params["b2"], 0.0)
    h = _layernorm(h, params["ln2_g"], params["ln2_b"])
    logits = h @ params["w3"] + params["b3"]
    return jnp.where(available_actions == 0.0, NEG_INF, logits)


if __name__ == "__main__":
    B, OBS_DIM, HIDDEN, ACT_DIM = 8, 10, 32, 5
    RET_SCALE = 10.0

    key = jax.random.PRNGKey(0)
    k_par, k_obs, k_ret, k_rew, k_av = jax.random.split(key, 5)

    params = make_params(k_par, OBS_DIM, HIDDEN, ACT_DIM)

    obs = jax.random.normal(k_obs, (B, OBS_DIM), jnp.float32)
    ret = jax.random.normal(k_ret, (B, 1), jnp.float32) * 5.0
    last_rew = jax.random.normal(k_rew, (B, 1), jnp.float32)
    avail = (jax.random.uniform(k_av, (B, ACT_DIM)) > 0.3).astype(jnp.float32)
    avail = avail.at[:, 0].set(1.0)

    logits = hdd_forward(params, obs, ret, last_rew, avail, ret_scale=RET_SCALE)
    jax.block_until_ready(logits)
    ref = hdd_reference(params, obs, ret, last_rew, avail, ret_scale=RET_SCALE)
    assert logits.shape == (B, ACT_DIM)
    assert jnp.allclose(logits, ref, atol=1e-4, rtol=1e-4), "mismatch vs reference (B=8)"

    # Non-divisible batch + multi-step grid: exercises tail padding and the
    # "parallel" grid axis (TensorCore sharding on v7x).
    B2 = 20
    k_obs2, k_ret2, k_rew2, k_av2 = jax.random.split(jax.random.PRNGKey(1), 4)
    obs2 = jax.random.normal(k_obs2, (B2, OBS_DIM), jnp.float32)
    ret2 = jax.random.normal(k_ret2, (B2, 1), jnp.float32) * 5.0
    rew2 = jax.random.normal(k_rew2, (B2, 1), jnp.float32)
    avail2 = (jax.random.uniform(k_av2, (B2, ACT_DIM)) > 0.3).astype(jnp.float32)
    avail2 = avail2.at[:, 0].set(1.0)

    logits2 = hdd_forward(params, obs2, ret2, rew2, avail2, ret_scale=RET_SCALE, tb=8)
    jax.block_until_ready(logits2)
    ref2 = hdd_reference(params, obs2, ret2, rew2, avail2, ret_scale=RET_SCALE)
    assert logits2.shape == (B2, ACT_DIM)
    assert jnp.allclose(logits2, ref2, atol=1e-4, rtol=1e-4), "mismatch vs reference (B=20)"

    # TODO(synk): CNNBase branch (3-D obs_space) and Categorical.log_prob not implemented;
    # vector-obs path returning masked logits only.
    print("KERNEL_OK")
</pallas_src>

<mosaic_0001>
module attributes {stable_mosaic.version = 11 : i64} {
  func.func @hdd_kernel(%arg0: i32, %arg1: memref<8x10xf32, #tpu.memory_space<vmem>>, %arg2: memref<8x1xf32, #tpu.memory_space<vmem>>, %arg3: memref<8x1xf32, #tpu.memory_space<vmem>>, %arg4: memref<9x128xf32, #tpu.memory_space<vmem>>, %arg5: memref<12x32xf32, #tpu.memory_space<vmem>>, %arg6: memref<32x32xf32, #tpu.memory_space<vmem>>, %arg7: memref<32x128xf32, #tpu.memory_space<vmem>>, %arg8: memref<8x128xf32, #tpu.memory_space<vmem>>, %arg9: memref<8x128xf32, #tpu.memory_space<vmem>>) attributes {dimension_semantics = [#tpu.dimension_semantics<parallel>], iteration_bounds = array<i64: 1>, scalar_prefetch = 0 : i64, scratch_operands = 0 : i64, tpu.core_type = #tpu.core_type<tc>, window_params = [{transform_indices = @transform_0, window_bounds = array<i64: 8, 10>}, {transform_indices = @transform_1, window_bounds = array<i64: 8, 1>}, {transform_indices = @transform_2, window_bounds = array<i64: 8, 1>}, {pipeline_mode = #tpu.pipeline_mode<synchronous>, transform_indices = @transform_3, window_bounds = array<i64: 9, 128>}, {pipeline_mode = #tpu.pipeline_mode<synchronous>, transform_indices = @transform_4, window_bounds = array<i64: 12, 32>}, {pipeline_mode = #tpu.pipeline_mode<synchronous>, transform_indices = @transform_5, window_bounds = array<i64: 32, 32>}, {pipeline_mode = #tpu.pipeline_mode<synchronous>, transform_indices = @transform_6, window_bounds = array<i64: 32, 128>}, {transform_indices = @transform_7, window_bounds = array<i64: 8, 128>}, {transform_indices = @transform_8, window_bounds = array<i64: 8, 128>}]} {
    %c0 = arith.constant 0 : index
    %c0_0 = arith.constant 0 : index
    %0 = vector.load %arg1[%c0, %c0_0] : memref<8x10xf32, #tpu.memory_space<vmem>>, vector<8x10xf32>
    %c0_1 = arith.constant 0 : index
    %c0_2 = arith.constant 0 : index
    %1 = vector.load %arg2[%c0_1, %c0_2] : memref<8x1xf32, #tpu.memory_space<vmem>>, vector<8x1xf32>
    %c0_3 = arith.constant 0 : index
    %c0_4 = arith.constant 0 : index
    %2 = vector.load %arg3[%c0_3, %c0_4] : memref<8x1xf32, #tpu.memory_space<vmem>>, vector<8x1xf32>
    %cst = arith.constant 1.000000e+01 : f32
    %3 = vector.broadcast %cst : f32 to vector<8x1xf32>
    %4 = arith.divf %2, %3 : vector<8x1xf32>
    %c0_5 = arith.constant 0 : index
    %c0_6 = arith.constant 0 : index
    %5 = vector.load %arg4[%c0_5, %c0_6] : memref<9x128xf32, #tpu.memory_space<vmem>>, vector<9x128xf32>
    %6 = vector.extract_strided_slice %5 {offsets = [0, 0], sizes = [1, 10], strides = [1, 1]} : vector<9x128xf32> to vector<1x10xf32>
    %7 = vector.extract_strided_slice %5 {offsets = [0, 10], sizes = [1, 1], strides = [1, 1]} : vector<9x128xf32> to vector<1x1xf32>
    %8 = vector.extract_strided_slice %5 {offsets = [0, 11], sizes = [1, 1], strides = [1, 1]} : vector<9x128xf32> to vector<1x1xf32>
    %9 = vector.extract_strided_slice %5 {offsets = [1, 0], sizes = [1, 10], strides = [1, 1]} : vector<9x128xf32> to vector<1x10xf32>
    %10 = vector.extract_strided_slice %5 {offsets = [1, 10], sizes = [1, 1], strides = [1, 1]} : vector<9x128xf32> to vector<1x1xf32>
    %11 = vector.extract_strided_slice %5 {offsets = [1, 11], sizes = [1, 1], strides = [1, 1]} : vector<9x128xf32> to vector<1x1xf32>
    %12 = vector.extract_strided_slice %5 {offsets = [2, 0], sizes = [1, 32], strides = [1, 1]} : vector<9x128xf32> to vector<1x32xf32>
    %13 = vector.extract_strided_slice %5 {offsets = [3, 0], sizes = [1, 32], strides = [1, 1]} : vector<9x128xf32> to vector<1x32xf32>
    %14 = vector.extract_strided_slice %5 {offsets = [4, 0], sizes = [1, 32], strides = [1, 1]} : vector<9x128xf32> to vector<1x32xf32>
    %15 = vector.extract_strided_slice %5 {offsets = [5, 0], sizes = [1, 32], strides = [1, 1]} : vector<9x128xf32> to vector<1x32xf32>
    %16 = vector.extract_strided_slice %5 {offsets = [6, 0], sizes = [1, 32], strides = [1, 1]} : vector<9x128xf32> to vector<1x32xf32>
    %17 = vector.extract_strided_slice %5 {offsets = [7, 0], sizes = [1, 32], strides = [1, 1]} : vector<9x128xf32> to vector<1x32xf32>
    %18 = vector.extract_strided_slice %5 {offsets = [8, 0], sizes = [1, 128], strides = [1, 1]} : vector<9x128xf32> to vector<1x128xf32>
    %cst_7 = arith.constant dense<0.000000e+00> : vector<8xf32>
    %19 = vector.multi_reduction <add>, %0, %cst_7 [1] : vector<8x10xf32> to vector<8xf32>
    %20 = vector.shape_cast %19 : vector<8xf32> to vector<8x1xf32>
    %21 = arith.addf %20, %1 : vector<8x1xf32>
    %22 = arith.addf %21, %4 : vector<8x1xf32>
    %cst_8 = arith.constant 0.0833333358 : f32
    %23 = vector.broadcast %cst_8 : f32 to vector<8x1xf32>
    %24 = arith.mulf %22, %23 : vector<8x1xf32>
    %25 = vector.broadcast %24 : vector<8x1xf32> to vector<8x10xf32>
    %26 = arith.subf %0, %25 : vector<8x10xf32>
    %27 = arith.subf %1, %24 : vector<8x1xf32>
    %28 = arith.subf %4, %24 : vector<8x1xf32>
    %29 = arith.mulf %26, %26 : vector<8x10xf32>
    %cst_9 = arith.constant dense<0.000000e+00> : vector<8xf32>
    %30 = vector.multi_reduction <add>, %29, %cst_9 [1] : vector<8x10xf32> to vector<8xf32>
    %31 = vector.shape_cast %30 : vector<8xf32> to vector<8x1xf32>
    %32 = arith.mulf %27, %27 : vector<8x1xf32>
    %33 = arith.addf %31, %32 : vector<8x1xf32>
    %34 = arith.mulf %28, %28 : vector<8x1xf32>
    %35 = arith.addf %33, %34 : vector<8x1xf32>
    %cst_10 = arith.constant 0.0833333358 : f32
    %36 = vector.broadcast %cst_10 : f32 to vector<8x1xf32>
    %37 = arith.mulf %35, %36 : vector<8x1xf32>
    %cst_11 = arith.constant 9.99999974E-6 : f32
    %38 = vector.broadcast %cst_11 : f32 to vector<8x1xf32>
    %39 = arith.addf %37, %38 : vector<8x1xf32>
    %40 = math.rsqrt %39 : vector<8x1xf32>
    %41 = vector.broadcast %40 : vector<8x1xf32> to vector<8x10xf32>
    %42 = arith.mulf %26, %41 : vector<8x10xf32>
    %43 = vector.broadcast %6 : vector<1x10xf32> to vector<8x10xf32>
    %44 = arith.mulf %42, %43 : vector<8x10xf32>
    %45 = vector.broadcast %9 : vector<1x10xf32> to vector<8x10xf32>
    %46 = arith.addf %44, %45 : vector<8x10xf32>
    %47 = arith.mulf %27, %40 : vector<8x1xf32>
    %48 = vector.broadcast %7 : vector<1x1xf32> to vector<8x1xf32>
    %49 = arith.mulf %47, %48 : vector<8x1xf32>
    %50 = vector.broadcast %10 : vector<1x1xf32> to vector<8x1xf32>
    %51 = arith.addf %49, %50 : vector<8x1xf32>
    %52 = arith.mulf %28, %40 : vector<8x1xf32>
    %53 = vector.broadcast %8 : vector<1x1xf32> to vector<8x1xf32>
    %54 = arith.mulf %52, %53 : vector<8x1xf32>
    %55 = vector.broadcast %11 : vector<1x1xf32> to vector<8x1xf32>
    %56 = arith.addf %54, %55 : vector<8x1xf32>
    %c0_12 = arith.constant 0 : index
    %c0_13 = arith.constant 0 : index
    %57 = vector.load %arg5[%c0_12, %c0_13] : memref<12x32xf32, #tpu.memory_space<vmem>>, vector<12x32xf32>
    %58 = vector.extract_strided_slice %57 {offsets = [0, 0], sizes = [10, 32], strides = [1, 1]} : vector<12x32xf32> to vector<10x32xf32>
    %cst_14 = arith.constant dense<0.000000e+00> : vector<8x32xf32>
    %59 = tpu.matmul %46, %58, %cst_14 {dimension_numbers = #tpu.dot_dimension_numbers<[1], [0], [0], [1], [0, 0, 1, 1], [], []>} : vector<8x10xf32>, vector<10x32xf32>, vector<8x32xf32> -> vector<8x32xf32>
    %60 = vector.extract_strided_slice %57 {offsets = [10, 0], sizes = [1, 32], strides = [1, 1]} : vector<12x32xf32> to vector<1x32xf32>
    %61 = vector.broadcast %51 : vector<8x1xf32> to vector<8x32xf32>
    %62 = vector.broadcast %60 : vector<1x32xf32> to vector<8x32xf32>
    %63 = arith.mulf %61, %62 : vector<8x32xf32>
    %64 = arith.addf %59, %63 : vector<8x32xf32>
    %65 = vector.extract_strided_slice %57 {offsets = [11, 0], sizes = [1, 32], strides = [1, 1]} : vector<12x32xf32> to vector<1x32xf32>
    %66 = vector.broadcast %56 : vector<8x1xf32> to vector<8x32xf32>
    %67 = vector.broadcast %65 : vector<1x32xf32> to vector<8x32xf32>
    %68 = arith.mulf %66, %67 : vector<8x32xf32>
    %69 = arith.addf %64, %68 : vector<8x32xf32>
    %70 = vector.broadcast %12 : vector<1x32xf32> to vector<8x32xf32>
    %71 = arith.addf %69, %70 : vector<8x32xf32>
    %cst_15 = arith.constant 0.000000e+00 : f32
    %72 = vector.broadcast %cst_15 : f32 to vector<8x32xf32>
    %73 = arith.maximumf %71, %72 : vector<8x32xf32>
    %cst_16 = arith.constant dense<0.000000e+00> : vector<8xf32>
    %74 = vector.multi_reduction <add>, %73, %cst_16 [1] : vector<8x32xf32> to vector<8xf32>
    %75 = vector.shape_cast %74 : vector<8xf32> to vector<8x1xf32>
    %cst_17 = arith.constant 3.200000e+01 : f32
    %76 = vector.broadcast %cst_17 : f32 to vector<8x1xf32>
    %77 = arith.divf %75, %76 : vector<8x1xf32>
    %78 = vector.broadcast %77 : vector<8x1xf32> to vector<8x32xf32>
    %79 = arith.subf %73, %78 : vector<8x32xf32>
    %80 = arith.mulf %79, %79 : vector<8x32xf32>
    %cst_18 = arith.constant dense<0.000000e+00> : vector<8xf32>
    %81 = vector.multi_reduction <add>, %80, %cst_18 [1] : vector<8x32xf32> to vector<8xf32>
    %82 = vector.shape_cast %81 : vector<8xf32> to vector<8x1xf32>
    %cst_19 = arith.constant 3.200000e+01 : f32
    %83 = vector.broadcast %cst_19 : f32 to vector<8x1xf32>
    %84 = arith.divf %82, %83 : vector<8x1xf32>
    %85 = vector.broadcast %77 : vector<8x1xf32> to vector<8x32xf32>
    %86 = arith.subf %73, %85 : vector<8x32xf32>
    %cst_20 = arith.constant 9.99999974E-6 : f32
    %87 = vector.broadcast %cst_20 : f32 to vector<8x1xf32>
    %88 = arith.addf %84, %87 : vector<8x1xf32>
    %89 = math.rsqrt %88 : vector<8x1xf32>
    %90 = vector.broadcast %89 : vector<8x1xf32> to vector<8x32xf32>
    %91 = arith.mulf %86, %90 : vector<8x32xf32>
    %92 = vector.broadcast %13 : vector<1x32xf32> to vector<8x32xf32>
    %93 = arith.mulf %91, %92 : vector<8x32xf32>
    %94 = vector.broadcast %14 : vector<1x32xf32> to vector<8x32xf32>
    %95 = arith.addf %93, %94 : vector<8x32xf32>
    %c0_21 = arith.constant 0 : index
    %c0_22 = arith.constant 0 : index
    %96 = vector.load %arg6[%c0_21, %c0_22] : memref<32x32xf32, #tpu.memory_space<vmem>>, vector<32x32xf32>
    %cst_23 = arith.constant dense<0.000000e+00> : vector<8x32xf32>
    %97 = tpu.matmul %95, %96, %cst_23 {dimension_numbers = #tpu.dot_dimension_numbers<[1], [0], [0], [1], [0, 0, 1, 1], [], []>} : vector<8x32xf32>, vector<32x32xf32>, vector<8x32xf32> -> vector<8x32xf32>
    %98 = vector.broadcast %15 : vector<1x32xf32> to vector<8x32xf32>
    %99 = arith.addf %97, %98 : vector<8x32xf32>
    %cst_24 = arith.constant 0.000000e+00 : f32
    %100 = vector.broadcast %cst_24 : f32 to vector<8x32xf32>
    %101 = arith.maximumf %99, %100 : vector<8x32xf32>
    %cst_25 = arith.constant dense<0.000000e+00> : vector<8xf32>
    %102 = vector.multi_reduction <add>, %101, %cst_25 [1] : vector<8x32xf32> to vector<8xf32>
    %103 = vector.shape_cast %102 : vector<8xf32> to vector<8x1xf32>
    %cst_26 = arith.constant 3.200000e+01 : f32
    %104 = vector.broadcast %cst_26 : f32 to vector<8x1xf32>
    %105 = arith.divf %103, %104 : vector<8x1xf32>
    %106 = vector.broadcast %105 : vector<8x1xf32> to vector<8x32xf32>
    %107 = arith.subf %101, %106 : vector<8x32xf32>
    %108 = arith.mulf %107, %107 : vector<8x32xf32>
    %cst_27 = arith.constant dense<0.000000e+00> : vector<8xf32>
    %109 = vector.multi_reduction <add>, %108, %cst_27 [1] : vector<8x32xf32> to vector<8xf32>
    %110 = vector.shape_cast %109 : vector<8xf32> to vector<8x1xf32>
    %cst_28 = arith.constant 3.200000e+01 : f32
    %111 = vector.broadcast %cst_28 : f32 to vector<8x1xf32>
    %112 = arith.divf %110, %111 : vector<8x1xf32>
    %113 = vector.broadcast %105 : vector<8x1xf32> to vector<8x32xf32>
    %114 = arith.subf %101, %113 : vector<8x32xf32>
    %cst_29 = arith.constant 9.99999974E-6 : f32
    %115 = vector.broadcast %cst_29 : f32 to vector<8x1xf32>
    %116 = arith.addf %112, %115 : vector<8x1xf32>
    %117 = math.rsqrt %116 : vector<8x1xf32>
    %118 = vector.broadcast %117 : vector<8x1xf32> to vector<8x32xf32>
    %119 = arith.mulf %114, %118 : vector<8x32xf32>
    %120 = vector.broadcast %16 : vector<1x32xf32> to vector<8x32xf32>
    %121 = arith.mulf %119, %120 : vector<8x32xf32>
    %122 = vector.broadcast %17 : vector<1x32xf32> to vector<8x32xf32>
    %123 = arith.addf %121, %122 : vector<8x32xf32>
    %c0_30 = arith.constant 0 : index
    %c0_31 = arith.constant 0 : index
    %124 = vector.load %arg7[%c0_30, %c0_31] : memref<32x128xf32, #tpu.memory_space<vmem>>, vector<32x128xf32>
    %cst_32 = arith.constant dense<0.000000e+00> : vector<8x128xf32>
    %125 = tpu.matmul %123, %124, %cst_32 {dimension_numbers = #tpu.dot_dimension_numbers<[1], [0], [0], [1], [0, 0, 1, 1], [], []>} : vector<8x32xf32>, vector<32x128xf32>, vector<8x128xf32> -> vector<8x128xf32>
    %126 = vector.broadcast %18 : vector<1x128xf32> to vector<8x128xf32>
    %127 = arith.addf %125, %126 : vector<8x128xf32>
    %c0_33 = arith.constant 0 : index
    %c0_34 = arith.constant 0 : index
    %128 = vector.load %arg8[%c0_33, %c0_34] : memref<8x128xf32, #tpu.memory_space<vmem>>, vector<8x128xf32>
    %cst_35 = arith.constant 0.000000e+00 : f32
    %129 = vector.broadcast %cst_35 : f32 to vector<8x128xf32>
    %130 = arith.cmpf oeq, %128, %129 : vector<8x128xf32>
    %cst_36 = arith.constant -1.000000e+10 : f32
    %131 = vector.broadcast %cst_36 : f32 to vector<8x128xf32>
    %132 = arith.select %130, %131, %127 : vector<8x128xi1>, vector<8x128xf32>
    %c0_37 = arith.constant 0 : index
    %c0_38 = arith.constant 0 : index
    %133 = vector.load %arg9[%c0_37, %c0_38] : memref<8x128xf32, #tpu.memory_space<vmem>>, vector<8x128xf32>
    tpu.vector_store %arg9[%c0_37, %c0_38], %132 {strides = array<i32>} : memref<8x128xf32, #tpu.memory_space<vmem>>, vector<8x128xf32>,
    return
  }
  func.func @transform_0(%arg0: i32) -> (i32, i32) {
    %c0_i32 = arith.constant 0 : i32
    %c0_i32_0 = arith.constant 0 : i32
    return %arg0, %c0_i32 : i32, i32
  }
  func.func @transform_1(%arg0: i32) -> (i32, i32) {
    %c0_i32 = arith.constant 0 : i32
    %c0_i32_0 = arith.constant 0 : i32
    return %arg0, %c0_i32 : i32, i32
  }
  func.func @transform_2(%arg0: i32) -> (i32, i32) {
    %c0_i32 = arith.constant 0 : i32
    %c0_i32_0 = arith.constant 0 : i32
    return %arg0, %c0_i32 : i32, i32
  }
  func.func @transform_3(%arg0: i32) -> (i32, i32) {
    %c0_i32 = arith.constant 0 : i32
    %c0_i32_0 = arith.constant 0 : i32
    %c0_i32_1 = arith.constant 0 : i32
    return %c0_i32, %c0_i32_0 : i32, i32
  }
  func.func @transform_4(%arg0: i32) -> (i32, i32) {
    %c0_i32 = arith.constant 0 : i32
    %c0_i32_0 = arith.constant 0 : i32
    %c0_i32_1 = arith.constant 0 : i32
    return %c0_i32, %c0_i32_0 : i32, i32
  }
  func.func @transform_5(%arg0: i32) -> (i32, i32) {
    %c0_i32 = arith.constant 0 : i32
    %c0_i32_0 = arith.constant 0 : i32
    %c0_i32_1 = arith.constant 0 : i32
    return %c0_i32, %c0_i32_0 : i32, i32
  }
  func.func @transform_6(%arg0: i32) -> (i32, i32) {
    %c0_i32 = arith.constant 0 : i32
    %c0_i32_0 = arith.constant 0 : i32
    %c0_i32_1 = arith.constant 0 : i32
    return %c0_i32, %c0_i32_0 : i32, i32
  }
  func.func @transform_7(%arg0: i32) -> (i32, i32) {
    %c0_i32 = arith.constant 0 : i32
    %c0_i32_0 = arith.constant 0 : i32
    return %arg0, %c0_i32 : i32, i32
  }
  func.func @transform_8(%arg0: i32) -> (i32, i32) {
    %c0_i32 = arith.constant 0 : i32
    %c0_i32_0 = arith.constant 0 : i32
    return %arg0, %c0_i32 : i32, i32
  }
}

</mosaic_0001>

<bundles_post_ra>
// kernel: hdd_forward.1
= control target key start
LH: loop header
LB: loop body
LE: loop exit
PB: predicated region body
PF: predicated region fallthrough
CT: control target
= control target key end

     0   :  { %vm37_vm0 = vcmask 80896   ;;  %s687_s0 = inlined_call_operand.vmem [shape: f32[8,10], index: 0, kind: input, shape index: {}]   ;;  %s688_s1 = inlined_call_operand.vmem [shape: f32[8,1], index: 1, kind: input, shape index: {}]   ;;  %s689_s2 = inlined_call_operand.vmem [shape: f32[8,1], index: 2, kind: input, shape index: {}]   ;;  %s690_s3 = inlined_call_operand.vmem [shape: f32[9,128], index: 3, kind: input, shape index: {}]   ;;  %s691_s4 = inlined_call_operand.vmem [shape: f32[12,32], index: 4, kind: input, shape index: {}]   ;;  %s692_s5 = inlined_call_operand.vmem [shape: f32[32,32], index: 5, kind: input, shape index: {}]   ;;  %s693_s6 = inlined_call_operand.vmem [shape: f32[32,128], index: 6, kind: input, shape index: {}]   ;;  %s694_s7 = inlined_call_operand.vmem [shape: f32[8,128], index: 7, kind: input, shape index: {}]   ;;  %s695_s8 = inlined_call_operand.hbm [shape: f32[8,128], index: 8, kind: output, shape index: {}]  }
   0x1   :  { %v30_v0 = vld [vmem:[%s687_s0] sm:$0xff] }
   0x2   :  { %v38_v1 = vsel %vm37_vm0, %v30_v0, 0.0 }
   0x3   :  { %13 = vsyncpa [#allocation3], 0  ;;  %39 = vadd.xlane.f32.xlu0 %v38_v1  ;;  %v537_v2 = vmov 0   ;;  %v32_v3 = vld [vmem:[%s689_s2] sm:$0xff]  ;;  %v69_v23 = vlaneseq  ;;  %v100_v31 = vld [vmem:[%s691_s4 + $0x8] sm:$0xf] }
   0x4   :  { %505 = vset.pattern.permute.xlu0 %v537_v2  ;;  %506 = vset.pattern.permute.xlu1 %v537_v2  ;;  %v31_v4 = vld [vmem:[%s688_s1] sm:$0xff]  ;;  %v34_v5 = vmul.f32 0.1, %v32_v3  ;;  %vm114_vm1 = vcmask 1041408   ;;  %v538_v33 = vmov 0.0|0.0   ;;  %vm539_vm2 = vmmov 1  }
   0x5   :  { %v601_v24 = vshrl.u32 %v69_v23, 7  ;;  %v607_v26 = vld [vmem:[%s690_s3] sm:$0xff]  ;;  %481 = vmatprep.subr.bf16.mxu0 %v538_v33  ;;  %vm483_vm3 = vmpackc.low %vm114_vm1, %vm539_vm2  ;;  %485 = vmatprep.subr.bf16.mxu1 %v538_v33  ;;  %s540_s14 = smov 118   ;;  %vm541_vm4 = vmmov 0   ;;  %v542_v35 = vmov 0.0   ;;  %vm205_vm5 = vcmask 261120  }
   0x6   :  { %v99_v30 = vld [vmem:[%s691_s4] sm:$0xff]  ;;  %456 = vmatprep.mubr.msk.f32.mxu0 %vm541_vm4, %v542_v35  ;;  %467 = vmatprep.mubr.msk.f32.mxu1 %vm541_vm4, %v542_v35  ;;  %s543_s4 = smov 117   ;;  %s544_s0 = smov [#allocation2]  }
   0x7   :  { %v71_v25 = vsub.s32 0, %v601_v24  ;;  %v76_v29 = vsub.s32 1, %v601_v24  ;;  %v482_v32 = vpack.c.bf16 %v100_v31, %v99_v30  ;;  %v108_v50 = vsub.s32 2, %v601_v24  ;;  %s426_s1 = sshll.u32 %s544_s0, 4  ;;  %s427_s1 = int_to_ptr.vmem [resolvable:$true] %s426_s1 }
   0x8   :  { %v195_v51 = vsub.s32 3, %v601_v24  ;;  %v236_v23 = vsub.s32 5, %v601_v24  ;;  %s513_s2 = scalar_lea.vmem %s427_s1, 128  ;;  %p518_p1 = scmp.lt.s32.totalorder %s427_s1, %s427_s1 }
   0x9   :  { %v72_v28 = vrot.slane %v607_v26, %v71_v25  ;;  %484 = vmatpush3.bf16.msk.msra.mxu0 %vm483_vm3, %v482_v32  ;;  %v77_v34 = vrot.slane %v607_v26, %v76_v29  ;;  %v109_v53 = vrot.slane %v100_v31, %v108_v50  ;;  %v202_v61 = vrot.slane %v607_v26, %v108_v50  ;;  %p514_p0 = scmp.ne.s32.totalorder %s427_s1, %s513_s2  ;;  %p519_p2 = scmp.lt.s32.totalorder %s513_s2, %s513_s2 }
   0xa   :  { %491 = vmatprep.subr.bf16.mxu0 %v538_v33  ;;  %v196_v54 = vrot.slane %v100_v31, %v195_v51  ;;  %v237_v25 = vrot.slane %v607_v26, %v236_v23 }
   0xb   :  { %p520_p3 = por %p519_p2, %p518_p1 }
   0xd   :  { %p521_p4 = pnand %p520_p3, %p514_p0 }
  0x90   :  { %v40_v6 = vpop.xlane.xlu0 %39 }
  0x91   :  { %v41_v7 = vadd.f32 %v40_v6, %v31_v4 }
  0x93   :  { %v42_v8 = vadd.f32 %v41_v7, %v34_v5  ;;  %v230_v7 = vld [vmem:[%s692_s5] sm:$0xff] }
  0x95   :  { %v43_v9 = vmul.f32 0.083333336, %v42_v8  ;;  %v231_v8 = vld [vmem:[%s692_s5 + $0x8] sm:$0xff] }
  0x97   :  { %v50_v10 = vsub.f32 %v31_v4, %v43_v9  ;;  %46 = vperm.xlu0 %505, %v43_v9   ;;  %v51_v11 = vsub.f32 %v34_v5, %v43_v9  ;;  %v232_v9 = vld [vmem:[%s692_s5 + $0x10] sm:$0xff] }
  0x99   :  { %v56_v16 = vmul.f32 %v50_v10, %v50_v10  ;;  %v58_v19 = vmul.f32 %v51_v11, %v51_v11 }
 0x116   :  { %v47_v12 = vpop.permute.xlu0 %46 }
 0x117   :  { %v49_v13 = vsub.f32 %v30_v0, %v47_v12 }
 0x119   :  { %v52_v14 = vmul.f32 %v49_v13, %v49_v13 }
 0x11b   :  { %v53_v15 = vsel %vm37_vm0, %v52_v14, 0.0 }
 0x11c   :  { %54 = vadd.xlane.f32.xlu1 %v53_v15 }
 0x1a9   :  { %v55_v17 = vpop.xlane.xlu1 %54 }
 0x1aa   :  { %v57_v18 = vadd.f32 %v56_v16, %v55_v17  ;;  %v227_v16 = vsub.s32 4, %v601_v24  ;;  %v223_v17 = vrot.slane %v607_v26, %v195_v51 }
 0x1ac   :  { %v59_v20 = vadd.f32 %v58_v19, %v57_v18 }
 0x1ae   :  { %v60_v21 = vmul.f32 0.083333336, %v59_v20  ;;  %v228_v20 = vrot.slane %v607_v26, %v227_v16 }
 0x1b0   :  { %v61_v22 = vadd.f32 1e-05, %v60_v21 }
 0x1b2   :  { %507 = vrsqrt.f32 %v61_v22 }
 0x1bc   :  { %v508_v27 = vpop.eup %507 }
 0x1bd   :  { %65 = vperm.xlu1 %506, %v508_v27   ;;  %v79_v41 = vmul.f32 %v508_v27, %v50_v10  ;;  %v90_v46 = vmul.f32 %v508_v27, %v51_v11  ;;  %v486_v10 = vpack.c.bf16 %v231_v8, %v230_v7  ;;  %v233_v11 = vld [vmem:[%s692_s5 + $0x18] sm:$0xff] }
 0x1be   :  { %v489_v12 = vpack.c.bf16 %v233_v11, %v232_v9 }
 0x1bf   :  { %487 = vmatpush3.bf16.msra.mxu1 %v486_v10 }
 0x1c0   :  { %488 = vmatprep.subr.bf16.mxu1 %v538_v33 }
 0x1c1   :  { %81 = vrot.lane.b32.xlu1 %v72_v28, %s540_s14 }
 0x1c3   :  { %490 = vmatpush3.bf16.msra.mxu1 %v489_v12 }
 0x1c5   :  { %86 = vrot.lane.b32.xlu1 %v77_v34, %s540_s14 }
 0x1c9   :  { %91 = vrot.lane.b32.xlu1 %v72_v28, %s543_s4 }
 0x1cd   :  { %95 = vrot.lane.b32.xlu1 %v77_v34, %s543_s4 }
 0x23c   :  { %v66_v36 = vpop.permute.xlu1 %65 }
 0x23d   :  { %v68_v37 = vmul.f32 %v66_v36, %v49_v13 }
 0x23f   :  { %v73_v38 = vmul.f32 %v72_v28, %v68_v37 }
 0x240   :  { %v82_v39 = vpop.permute.xlu1 %81 }
 0x241   :  { %v78_v40 = vadd.f32 %v77_v34, %v73_v38  ;;  %v84_v42 = vmul.f32 %v82_v39, %v79_v41  ;;  %v335_v38 = vld [vmem:[%s693_s6] sm:$0xff]  ;;  %v336_v39 = vld [vmem:[%s693_s6 + $0x8] sm:$0xff]  ;;  %v337_v41 = vld [vmem:[%s693_s6 + $0x10] sm:$0xff] }
 0x243   :  { %457 = vmatmul.mubr.msk.f32.vlgmr.msra.gmra.mrb[0].mxu0 %vm37_vm0, %v78_v40  ;;  %v492_v40 = vpack.c.bf16 %v336_v39, %v335_v38 }
 0x244   :  { %v87_v43 = vpop.permute.xlu1 %86  ;;  %478 = vmatprep.mubr.msk.f32.mxu0 %vm541_vm4, %v542_v35 }
 0x245   :  { %v89_v44 = vadd.f32 %v87_v43, %v84_v42  ;;  %493 = vmatpush3.bf16.msra.mxu0 %v492_v40  ;;  %v338_v42 = vld [vmem:[%s693_s6 + $0x18] sm:$0xff] }
 0x246   :  { %494 = vmatprep.subr.bf16.mxu0 %v538_v33  ;;  %v495_v43 = vpack.c.bf16 %v338_v42, %v337_v41 }
 0x247   :  { %103 = vperm.xlu1 %506, %v89_v44  }
 0x248   :  { %v92_v45 = vpop.permute.xlu1 %91 }
 0x249   :  { %v94_v47 = vmul.f32 %v92_v45, %v90_v46  ;;  %496 = vmatpush3.bf16.msra.mxu0 %v495_v43 }
 0x24c   :  { %v96_v48 = vpop.permute.xlu1 %95 }
 0x24d   :  { %v98_v49 = vadd.f32 %v96_v48, %v94_v47  ;;  %v327_v47 = vsub.s32 6, %v601_v24  ;;  %v332_v48 = vsub.s32 7, %v601_v24 }
 0x24f   :  { %190 = vperm.xlu1 %506, %v98_v49   ;;  %v328_v33 = vrot.slane %v607_v26, %v327_v47  ;;  %v333_v51 = vrot.slane %v607_v26, %v332_v48 }
 0x2c6   :  { %v104_v52 = vpop.permute.xlu1 %103 }
 0x2c7   :  { %v110_v56 = vmul.f32 %v109_v53, %v104_v52 }
 0x2ce   :  { %v191_v55 = vpop.permute.xlu1 %190 }
 0x2cf   :  { %v197_v58 = vmul.f32 %v196_v54, %v191_v55  ;;  %v416_v54 = vld [vmem:[%s694_s7] sm:$0xff]  ;;  %v437_v55 = vld [vmem:[%s690_s3 + $0x8] ss:$0 sm:$0xff] }
 0x2d0   :  { %vm417_vm6 = vcmp.eq.f32.partialorder %v416_v54, 0.0 }
 0x316   :  { %v184_v57 = vpop.f32.mrb[0].mxu0 }
 0x317   :  { %v185_v59 = vadd.f32 %v184_v57, %v110_v56  ;;  %v458_v60 = vpop.f32.mrb[1].mxu0 }
 0x319   :  { %v198_v62 = vadd.f32 %v197_v58, %v185_v59 }
 0x31b   :  { %v203_v63 = vadd.f32 %v202_v61, %v198_v62 }
 0x31d   :  { %v204_v0 = vmax.f32 %v203_v63, 0.0 }
 0x31f   :  { %v206_v1 = vsel %vm205_vm5, %v204_v0, 0.0 }
 0x320   :  { %207 = vadd.xlane.f32.xlu1 %v206_v1 }
 0x3ad   :  { %v208_v2 = vpop.xlane.xlu1 %207 }
 0x3ae   :  { %v210_v3 = vmul.f32 0.03125, %v208_v2 }
 0x3b0   :  { %v211_v4 = vsub.f32 %v204_v0, %v210_v3 }
 0x3b2   :  { %v212_v5 = vmul.f32 %v211_v4, %v211_v4 }
 0x3b4   :  { %v213_v6 = vsel %vm205_vm5, %v212_v5, 0.0 }
 0x3b5   :  { %214 = vadd.xlane.f32.xlu0 %v213_v6 }
 0x442   :  { %v215_v13 = vpop.xlane.xlu0 %214 }
 0x443   :  { %v216_v14 = vmul.f32 0.03125, %v215_v13 }
 0x445   :  { %v217_v15 = vadd.f32 1e-05, %v216_v14 }
 0x447   :  { %509 = vrsqrt.f32 %v217_v15 }
 0x451   :  { %v510_v18 = vpop.eup %509 }
 0x452   :  { %v219_v19 = vmul.f32 %v510_v18, %v211_v4 }
 0x454   :  { %v224_v21 = vmul.f32 %v223_v17, %v219_v19 }
 0x456   :  { %v229_v22 = vadd.f32 %v228_v20, %v224_v21 }
 0x458   :  { %468 = vmatmul.mubr.msk.f32.vlgmr.msra.gmra.mrb[0].mxu1 %vm205_vm5, %v229_v22 }
 0x52b   :  { %v307_v27 = vpop.f32.mrb[0].mxu1 }
 0x52c   :  { %v308_v28 = vadd.f32 %v307_v27, %v237_v25  ;;  %v469_v29 = vpop.f32.mrb[1].mxu1 }
 0x52e   :  { %v311_v30 = vmax.f32 %v308_v28, 0.0 }
 0x530   :  { %v312_v31 = vsel %vm205_vm5, %v311_v30, 0.0 }
 0x531   :  { %313 = vadd.xlane.f32.xlu0 %v312_v31 }
 0x5be   :  { %v314_v32 = vpop.xlane.xlu0 %313 }
 0x5bf   :  { %v315_v34 = vmul.f32 0.03125, %v314_v32 }
 0x5c1   :  { %v316_v35 = vsub.f32 %v311_v30, %v315_v34 }
 0x5c3   :  { %v317_v36 = vmul.f32 %v316_v35, %v316_v35 }
 0x5c5   :  { %v318_v37 = vsel %vm205_vm5, %v317_v36, 0.0 }
 0x5c6   :  { %319 = vadd.xlane.f32.xlu1 %v318_v37 }
 0x653   :  { %v320_v44 = vpop.xlane.xlu1 %319 }
 0x654   :  { %v321_v45 = vmul.f32 0.03125, %v320_v44 }
 0x656   :  { %v322_v46 = vadd.f32 1e-05, %v321_v45 }
 0x658   :  { %511 = vrsqrt.f32 %v322_v46 }
 0x662   :  { %v512_v49 = vpop.eup %511 }
 0x663   :  { %v324_v50 = vmul.f32 %v512_v49, %v316_v35 }
 0x665   :  { %v329_v52 = vmul.f32 %v328_v33, %v324_v50 }
 0x667   :  { %v334_v53 = vadd.f32 %v333_v51, %v329_v52 }
 0x669   :  { %479 = vmatmul.mubr.msk.f32.vlgmr.msra.gmra.mrb[2].mxu0 %vm205_vm5, %v334_v53 }
 0x73c   :  { %v412_v24 = vpop.f32.mrb[2].mxu0 }
 0x73d   :  { %v413_v56 = vadd.f32 %v437_v55, %v412_v24  ;;  %v480_v57 = vpop.f32.mrb[3].mxu0 }
 0x73f   :  { %v418_v26 = vsel %vm417_vm6, -1e+10, %v413_v56 }
 0x740   :  { %419 = vst [vmem:[#allocation2] sm:$0xff] %v418_v26 }
 0x741   :  { %524 = shalt.err (!%p521_p4)
}
 0x742   :  { %s525_s3 = scalar_lea.hbm %s695_s8, 128 }
 0x743   :  { %p526_p5 = scmp.ne.s32.totalorder %s695_s8, %s525_s3  ;;  %p529_p6 = scmp.lt.u32.totalorder %s525_s3, %s695_s8 }
 0x745   :  { %p531_p7 = pnand %p529_p6, %p526_p5 }
 0x747   :  { %534 = shalt.err (!%p531_p7)
}
 0x748   :  { %429 = dma.vmem_to_hbm [thread:$0]  %s427_s1, 128, %s695_s8, [#allocation3]  }
 0x749   :  { %535 = dma.done.wait [#allocation3], 128  }
 0x74a   :  { %536 = vsyncadd [#allocation3], 4294967168 }
 0x74b   :  { %433 = vsyncpa [#allocation3], 1 }

</bundles_post_ra>
